<compile_context>
chip_gen: v7x
topology: tpu7x:2x2x1
jax: 0.10.0
libtpu: 0.0.40
codegen_flags: <defaults>
</compile_context>

<pallas_src>
import functools

import jax
import jax.numpy as jnp
import numpy as np
from jax import lax
from jax.experimental import pallas as pl
from jax.experimental.pallas import tpu as pltpu

_TB = 256  # MXU cumsum sub-block width (multiple of 128; 256 is safe on v5e/v6e/v7x)


def _round_up(x, m):
    return (x + m - 1) // m * m


def _choose_tile(C, HW, max_tile):
    # Largest lane tile (multiple of the MXU sub-block) that keeps the double-buffered
    # kernel-1 window inside a conservative VMEM budget.
    budget = 24 * 1024 * 1024
    bytes_per_lane = 2 * (2 * C + 1) * 4          # (logits f32 + key f32) * C + labels i32, x2 buffers
    tile = min(int(max_tile), budget // bytes_per_lane, _round_up(HW, _TB))
    return max(_TB, (tile // _TB) * _TB)


# ----------------------------------------------------------------------------
# Kernel 1: fused relayout + softmax over classes + packed (negated) error keys
# ----------------------------------------------------------------------------
def _softmax_key_kernel(logits_ref, labels_ref, key_ref, *, ignore_index):
    logits = logits_ref[...]                       # (C, T) f32
    labels = labels_ref[...]                       # (1, T) i32
    C, T = logits.shape

    # softmax over the class (sublane) axis -- per pixel, so tiling over P is exact.
    # One reciprocal per pixel (EUP) + C multiplies instead of C divides.
    m = jnp.max(logits, axis=0, keepdims=True)
    e = jnp.exp(logits - m)
    probs = e * pl.reciprocal(jnp.sum(e, axis=0, keepdims=True), approx=False)

    cls = lax.broadcasted_iota(jnp.int32, (C, T), 0)
    valid = labels != ignore_index                 # (1, T)
    hit = (cls == labels) & valid                  # (C, T) one-hot mask
    one_hot = hit.astype(jnp.float32)

    # Negate so an ascending lax.sort yields errors in descending order.  Ignored / padded
    # pixels get 0.0 (the maximum of the keys) and sort to the tail, contributing nothing.
    neg_err = jnp.where(valid, -jnp.abs(one_hot - probs), 0.0)

    # Pack the one-hot bit into the key's mantissa LSB (<= 1 ulp perturbation of the error)
    # so the sort carries a single operand and kernel 2 reads a single array.
    bits = pltpu.bitcast(neg_err, jnp.int32)
    key_ref[...] = pltpu.bitcast((bits & jnp.int32(-2)) | hit.astype(jnp.int32), jnp.float32)


# ----------------------------------------------------------------------------
# Kernel 2: streaming Lovász extension of the Jaccard loss over the sorted keys.
# One pass over (C, P); in-tile cumsum on the MXU via a triangular-ones matmul,
# cross-tile state carried in (C,1) VMEM scratches.
# ----------------------------------------------------------------------------
def _lovasz_stream_kernel(key_ref, npos_ref, loss_ref, tri_ref,
                          cum_carry, jacc_carry, loss_acc):
    i = pl.program_id(0)
    C, T = key_ref.shape
    tb = tri_ref.shape[0]
    nsub = T // tb

    @pl.when(i == 0)
    def _():
        r = lax.broadcasted_iota(jnp.int32, (tb, tb), 0)
        c = lax.broadcasted_iota(jnp.int32, (tb, tb), 1)
        tri_ref[...] = (r <= c).astype(tri_ref.dtype)   # upper-tri (incl. diag) cumsum matrix
        cum_carry[...] = jnp.zeros_like(cum_carry)
        jacc_carry[...] = jnp.zeros_like(jacc_carry)
        loss_acc[...] = jnp.zeros_like(loss_acc)

    tri = tri_ref[...]                                  # (tb, tb) bf16, built once
    n_pos = npos_ref[...]                               # (C, 1) f32
    lane1 = lax.broadcasted_iota(jnp.int32, (1, tb), 1) # hoisted: JAX does not CSE broadcasts
    lanec = lax.broadcasted_iota(jnp.int32, (C, tb), 1)

    cum = cum_carry[...]                                # running cumsum of the sorted one-hot
    jprev = jacc_carry[...]                             # jacc of the previous element
    acc = loss_acc[...]                                 # per-class NEGATED loss accumulator
    base = i * T

    for s in range(nsub):                               # static sub-blocks; ref-sliced loads keep vregs small
        neg = key_ref[:, s * tb:(s + 1) * tb]           # (C, tb) packed keys (= -err, LSB = one-hot)
        bits = pltpu.bitcast(neg, jnp.int32)
        oh_bf = (bits & 1).astype(jnp.float32).astype(jnp.bfloat16)

        # Inclusive prefix sum of the one-hot bits on the MXU (exact: 0/1 operands, f32 acc).
        cs = jnp.dot(oh_bf, tri, preferred_element_type=jnp.float32) + cum   # (C, tb)

        # Global 1-indexed position.
        # TODO(synk): int->f32 position / cumsum lose integer exactness past 2^24 pixels.
        pos = (base + s * tb + 1 + lane1).astype(jnp.float32)                # (1, tb)
        inter = n_pos - cs
        union = n_pos + pos - cs                        # cumsum(1 - oh) = pos - cs; always >= 1
        jacc = 1.0 - inter * pl.reciprocal(union, approx=False)

        # Jaccard gradient: delta[k] = jacc[k] - jacc[k-1]; carries supply jacc[-1].
        prev = pltpu.roll(jacc, shift=1, axis=1)
        prev = jnp.where(lanec > 0, prev, jprev)
        acc = acc + jnp.sum(neg * (jacc - prev), axis=1, keepdims=True)      # negated errors

        cum = cs[:, tb - 1:tb]
        jprev = jacc[:, tb - 1:tb]

    cum_carry[...] = cum
    jacc_carry[...] = jprev
    loss_acc[...] = acc

    @pl.when(i == pl.num_programs(0) - 1)
    def _():
        loss_ref[...] = -acc                            # single negate + (C,1) store, off the hot loop


# ----------------------------------------------------------------------------
# Wrapper
# ----------------------------------------------------------------------------
def lovasz_softmax_v3(logits, labels, ignore_index=-100, reduction="mean", max_tile=8192):
    """Forward of LovaszSoftmaxV3.  logits: (N, C, H, W) float; labels: (N, H, W) int."""
    N, C, H, W = logits.shape
    HW = H * W

    tile = _choose_tile(C, HW, max_tile)
    hw_pad = _round_up(HW, tile)
    num_hw_tiles = hw_pad // tile
    P = N * hw_pad

    logits3 = logits.reshape(N, C, HW).astype(jnp.float32)   # contiguous reshape (no transpose)
    labels3 = labels.reshape(N, 1, HW).astype(jnp.int32)
    if hw_pad != HW:
        pad = hw_pad - HW
        logits3 = jnp.pad(logits3, ((0, 0), (0, 0), (0, pad)))
        labels3 = jnp.pad(labels3, ((0, 0), (0, 0), (0, pad)),
                          constant_values=ignore_index)       # padded pixels behave as ignored

    # --- kernel 1: relayout + softmax + packed per-class error keys (tiled, pipelined) ---
    keys = pl.pallas_call(
        functools.partial(_softmax_key_kernel, ignore_index=ignore_index),
        out_shape=jax.ShapeDtypeStruct((C, P), jnp.float32),
        grid=(N, num_hw_tiles),
        in_specs=[
            pl.BlockSpec((None, C, tile), lambda n, t: (n, 0, t)),
            pl.BlockSpec((None, 1, tile), lambda n, t: (n, 0, t)),
        ],
        out_specs=pl.BlockSpec((C, tile), lambda n, t: (0, n * num_hw_tiles + t)),
        compiler_params=pltpu.CompilerParams(
            dimension_semantics=("parallel", "parallel"),
            vmem_limit_bytes=32 * 1024 * 1024),
    )(logits3, labels3)

    # Per-class positive counts (invariant under sorting) -- one fused pass over labels only.
    classes = jnp.arange(C, dtype=jnp.int32)[:, None]                        # (C, 1)
    lab_flat = labels3.reshape(1, P)
    n_pos = jnp.sum(((lab_flat == classes) & (lab_flat != ignore_index))
                    .astype(jnp.float32), axis=1, keepdims=True)             # (C, 1)

    # TODO(synk): the per-class descending sort has no clean Pallas TPU equivalent; a single
    # ascending lax.sort of the packed keys replaces the previous variadic key+payload sort.
    keys_sorted = lax.sort(keys, dimension=1, is_stable=False)

    # --- kernel 2: streaming Jaccard gradient + dot product over the sorted keys ---
    # TODO(synk): on v7x a 2-chunk split (leading 'parallel' axis + analytic per-chunk carries)
    # would use both TensorCores; kept single-core here for simplicity.
    losses = pl.pallas_call(
        _lovasz_stream_kernel,
        out_shape=jax.ShapeDtypeStruct((C, 1), jnp.float32),
        grid=(P // tile,),
        in_specs=[
            pl.BlockSpec((C, tile), lambda i: (0, i)),
            pl.BlockSpec((C, 1), lambda i: (0, 0)),
        ],
        out_specs=pl.BlockSpec((C, 1), lambda i: (0, 0)),
        scratch_shapes=[
            pltpu.VMEM((_TB, _TB), jnp.bfloat16),   # upper-triangular cumsum matrix (built once)
            pltpu.VMEM((C, 1), jnp.float32),        # running cumsum of one-hot
            pltpu.VMEM((C, 1), jnp.float32),        # jacc value at the end of the previous tile
            pltpu.VMEM((C, 1), jnp.float32),        # per-class (negated) loss accumulator
        ],
        compiler_params=pltpu.CompilerParams(
            dimension_semantics=("arbitrary",),
            vmem_limit_bytes=32 * 1024 * 1024),
    )(keys_sorted, n_pos)[:, 0]                                              # (C,)

    if reduction == "sum":
        return losses.sum()
    if reduction == "mean":
        return losses.mean()
    return losses


# ----------------------------------------------------------------------------
# Pure numpy reference (mirrors LovaszSoftmaxV1/V3 forward) for verification.
# ----------------------------------------------------------------------------
def _ref_lovasz(logits, labels, ignore_index=-100):
    N, C, H, W = logits.shape
    lg = np.transpose(np.asarray(logits, np.float64), (1, 0, 2, 3)).reshape(C, -1)
    lb = np.asarray(labels).reshape(-1)
    keep = lb != ignore_index
    m = lg.max(axis=0, keepdims=True)
    e = np.exp(lg - m)
    probs = (e / e.sum(axis=0, keepdims=True))[:, keep]
    lb = lb[keep]
    one_hot = (np.arange(C)[:, None] == lb[None, :]).astype(np.float64)
    errs = np.abs(one_hot - probs)
    losses = []
    for c in range(C):
        order = np.argsort(-errs[c], kind="stable")
        es, ohs = errs[c][order], one_hot[c][order]
        n_pos = ohs.sum()
        inter = n_pos - np.cumsum(ohs)
        union = n_pos + np.cumsum(1.0 - ohs)
        jacc = 1.0 - inter / union
        if jacc.size > 1:
            jacc[1:] = jacc[1:] - jacc[:-1]
        losses.append((es * jacc).sum())
    return float(np.mean(losses))


if __name__ == "__main__":
    key = jax.random.PRNGKey(0)
    k1, k2, k3, k4 = jax.random.split(key, 4)

    # Case 1: HW=576 -> tile=768 (3 MXU sub-blocks), kernel-2 grid of 2 (cross-tile carry),
    # plus a padded / ignored tail.
    N, C, H, W = 2, 4, 24, 24
    logits = jax.random.normal(k1, (N, C, H, W), dtype=jnp.float32)
    labels = jax.random.randint(k2, (N, H, W), 0, C, dtype=jnp.int32)
    labels = labels.at[0, 0, :7].set(-100)
    labels = labels.at[1, 5, 3:9].set(-100)
    ref = _ref_lovasz(np.asarray(logits), np.asarray(labels), ignore_index=-100)

    loss = jax.block_until_ready(
        lovasz_softmax_v3(logits, labels, ignore_index=-100, reduction="mean"))
    assert np.allclose(float(loss), ref, atol=1e-4), (float(loss), ref)

    # Same inputs, forced small tile: multiple HW tiles in kernel 1, 6-step kernel-2 grid.
    loss_small = jax.block_until_ready(
        lovasz_softmax_v3(logits, labels, ignore_index=-100, reduction="mean", max_tile=256))
    assert np.allclose(float(loss_small), ref, atol=1e-4), (float(loss_small), ref)

    # Case 2: non-aligned spatial size -> exercises the padded / ignored tail path.
    N2, C2, H2, W2 = 3, 5, 10, 13
    logits2 = jax.random.normal(k3, (N2, C2, H2, W2), dtype=jnp.float32)
    labels2 = jax.random.randint(k4, (N2, H2, W2), 0, C2, dtype=jnp.int32)
    labels2 = labels2.at[2, 1, :5].set(-100)

    loss2 = jax.block_until_ready(
        lovasz_softmax_v3(logits2, labels2, ignore_index=-100, reduction="mean"))
    ref2 = _ref_lovasz(np.asarray(logits2), np.asarray(labels2), ignore_index=-100)
    assert np.allclose(float(loss2), ref2, atol=1e-4), (float(loss2), ref2)

    print("KERNEL_OK")
</pallas_src>

<mosaic_0001>
module attributes {stable_mosaic.version = 11 : i64} {
  func.func @_softmax_key_kernel(%arg0: i32, %arg1: i32, %arg2: memref<1x4x768xf32, #tpu.memory_space<vmem>>, %arg3: memref<1x1x768xi32, #tpu.memory_space<vmem>>, %arg4: memref<4x768xf32, #tpu.memory_space<vmem>>) attributes {dimension_semantics = [#tpu.dimension_semantics<parallel>, #tpu.dimension_semantics<parallel>], iteration_bounds = array<i64: 2, 1>, scalar_prefetch = 0 : i64, scratch_operands = 0 : i64, tpu.core_type = #tpu.core_type<tc>, window_params = [{transform_indices = @transform_0, window_bounds = array<i64: 1, 4, 768>}, {transform_indices = @transform_1, window_bounds = array<i64: 1, 1, 768>}, {transform_indices = @transform_2, window_bounds = array<i64: 4, 768>}]} {
    %c0 = arith.constant 0 : index
    %c0_0 = arith.constant 0 : index
    %c0_1 = arith.constant 0 : index
    %0 = vector.load %arg2[%c0, %c0_0, %c0_1] : memref<1x4x768xf32, #tpu.memory_space<vmem>>, vector<1x4x768xf32>
    %1 = vector.shape_cast %0 : vector<1x4x768xf32> to vector<4x768xf32>
    %c0_2 = arith.constant 0 : index
    %c0_3 = arith.constant 0 : index
    %c0_4 = arith.constant 0 : index
    %2 = vector.load %arg3[%c0_2, %c0_3, %c0_4] : memref<1x1x768xi32, #tpu.memory_space<vmem>>, vector<1x1x768xi32>
    %3 = vector.shape_cast %2 : vector<1x1x768xi32> to vector<1x768xi32>
    %cst = arith.constant dense<0xFF800000> : vector<768xf32>
    %4 = vector.multi_reduction <maximumf>, %1, %cst [0] : vector<4x768xf32> to vector<768xf32>
    %5 = vector.shape_cast %4 : vector<768xf32> to vector<1x768xf32>
    %6 = vector.broadcast %5 : vector<1x768xf32> to vector<4x768xf32>
    %7 = arith.subf %1, %6 : vector<4x768xf32>
    %8 = math.exp %7 : vector<4x768xf32>
    %cst_5 = arith.constant dense<0.000000e+00> : vector<768xf32>
    %9 = vector.multi_reduction <add>, %8, %cst_5 [0] : vector<4x768xf32> to vector<768xf32>
    %10 = vector.shape_cast %9 : vector<768xf32> to vector<1x768xf32>
    %11 = tpu.reciprocal %10 : vector<1x768xf32> -> vector<1x768xf32>
    %12 = vector.broadcast %11 : vector<1x768xf32> to vector<4x768xf32>
    %13 = arith.mulf %8, %12 : vector<4x768xf32>
    %14 = tpu.iota {dimensions = array<i32: 0>} : vector<4x768xi32>
    %c-100_i32 = arith.constant -100 : i32
    %15 = vector.broadcast %c-100_i32 : i32 to vector<1x768xi32>
    %16 = arith.cmpi ne, %3, %15 : vector<1x768xi32>
    %17 = vector.broadcast %3 : vector<1x768xi32> to vector<4x768xi32>
    %18 = arith.cmpi eq, %14, %17 : vector<4x768xi32>
    %19 = vector.broadcast %16 : vector<1x768xi1> to vector<4x768xi1>
    %20 = arith.andi %18, %19 : vector<4x768xi1>
    %21 = arith.extui %20 : vector<4x768xi1> to vector<4x768xi32>
    %22 = arith.sitofp %21 : vector<4x768xi32> to vector<4x768xf32>
    %23 = arith.subf %22, %13 : vector<4x768xf32>
    %24 = math.absf %23 : vector<4x768xf32>
    %cst_6 = arith.constant 0.000000e+00 : f32
    %25 = vector.broadcast %cst_6 : f32 to vector<4x768xf32>
    %26 = arith.subf %25, %24 : vector<4x768xf32>
    %cst_7 = arith.constant 0.000000e+00 : f32
    %27 = vector.shape_cast %16 : vector<1x768xi1> to vector<1x768xi1>
    %28 = vector.broadcast %27 : vector<1x768xi1> to vector<4x768xi1>
    %29 = vector.broadcast %cst_7 : f32 to vector<4x768xf32>
    %30 = arith.select %28, %26, %29 : vector<4x768xi1>, vector<4x768xf32>
    %31 = tpu.bitcast %30 : vector<4x768xf32> -> vector<4x768xi32>
    %c-2_i32 = arith.constant -2 : i32
    %32 = vector.broadcast %c-2_i32 : i32 to vector<4x768xi32>
    %33 = arith.andi %31, %32 : vector<4x768xi32>
    %34 = arith.extui %20 : vector<4x768xi1> to vector<4x768xi32>
    %35 = arith.ori %33, %34 : vector<4x768xi32>
    %36 = tpu.bitcast %35 : vector<4x768xi32> -> vector<4x768xf32>
    %c0_8 = arith.constant 0 : index
    %c0_9 = arith.constant 0 : index
    %37 = vector.load %arg4[%c0_8, %c0_9] : memref<4x768xf32, #tpu.memory_space<vmem>>, vector<4x768xf32>
    tpu.vector_store %arg4[%c0_8, %c0_9], %36 {strides = array<i32>} : memref<4x768xf32, #tpu.memory_space<vmem>>, vector<4x768xf32>,
    return
  }
  func.func @transform_0(%arg0: i32, %arg1: i32) -> (i32, i32, i32) {
    %c0_i32 = arith.constant 0 : i32
    %c0_i32_0 = arith.constant 0 : i32
    return %arg0, %c0_i32, %arg1 : i32, i32, i32
  }
  func.func @transform_1(%arg0: i32, %arg1: i32) -> (i32, i32, i32) {
    %c0_i32 = arith.constant 0 : i32
    %c0_i32_0 = arith.constant 0 : i32
    return %arg0, %c0_i32, %arg1 : i32, i32, i32
  }
  func.func @transform_2(%arg0: i32, %arg1: i32) -> (i32, i32) {
    %c1_i32 = arith.constant 1 : i32
    %0 = arith.muli %arg0, %c1_i32 : i32
    %1 = arith.addi %0, %arg1 : i32
    %c0_i32 = arith.constant 0 : i32
    %c0_i32_0 = arith.constant 0 : i32
    return %c0_i32, %1 : i32, i32
  }
}

</mosaic_0001>

<bundles_post_ra>
// kernel: tpu_custom_call.1
= control target key start
LH: loop header
LB: loop body
LE: loop exit
PB: predicated region body
PF: predicated region fallthrough
CT: control target
= control target key end

     0   :  { %7 = vsyncpa [#allocation3], 0  ;;  %s1290_s0 = inlined_call_operand.hbm [shape: f32[2,4,768], index: 0, kind: input, shape index: {}]   ;;  %s1291_s1 = inlined_call_operand.hbm [shape: s32[2,1,768], index: 1, kind: input, shape index: {}]   ;;  %s1292_s2 = inlined_call_operand.hbm [shape: f32[4,1536], index: 2, kind: output, shape index: {}]  }
   0x1   :  { %9 = vsyncpa [#allocation3 + $0x1], 0 }
   0x2   :  { %10 = vsyncpa [#allocation6], 0 }
   0x3   :  { %12 = vsyncpa [#allocation6 + $0x1], 0 }
   0x4   :  { %13 = vsyncpa [#allocation4], 0 }
   0x5   :  { %15 = vsyncpa [#allocation4 + $0x1], 0  ;;  %s920_s9 = smov 0   ;;  %s922_s10 = smov 0  }
   0x6   :  { %s924_s11 = smov 0   ;;  %s926_s12 = smov 0  }
   0x7   :  { %s928_s13 = smov 0   ;;  %s930_s14 = smov 0  }
   0x8 LB: > { %s639_s15 = sadd.s32 4294967295, %s898_s14   ;;  %s640_s16 = sadd.s32 4294967294, %s898_s14   ;;  %s898_s14 = sphi %s930_s14, %s21_s14   ;;  %s894_s13 = sphi %s928_s13, %s1323_s13   ;;  %s890_s12 = sphi %s926_s12, %s1322_s12   ;;  %s886_s11 = sphi %s924_s11, %s1321_s11   ;;  %s882_s10 = sphi %s922_s10, %s1320_s10   ;;  %s878_s9 = sphi %s920_s9, %s1319_s9  }
   0x9   : > { %s33_s17 = sadd.s32 1, %s894_s13  ;;  %s42_s18 = sadd.s32 1, %s886_s11 }
   0xa   : > { %p35_p0 = scmp.ge.s32.totalorder %s33_s17, 2  ;;  %p49_p1 = scmp.ne.s32.totalorder %s886_s11, %s882_s10 }
   0xb   : > { %p50_p2 = scmp.eq.s32.totalorder %s898_s14, 0  ;;  %p55_p3 = scmp.ne.s32.totalorder %s882_s10, %s878_s9 }
   0xc   : > { %s1325_s17 = smov (%p35_p0, %s33_s17), 0  ;;  %p56_p5 = scmp.eq.s32.totalorder %s639_s15, 0 }
   0xd   : > { %p961_p4 = por %p50_p2, %p49_p1  ;;  %s37_s20 = ssub.s32 %s894_s13, %s1325_s17 }
   0xe   : > { %p109_p6 = scmp.eq.s32.totalorder %s639_s15, 1  ;;  %p40_p7 = scmp.eq.s32.totalorder %s37_s20, 0 }
   0xf   : > { %p967_p8 = por %p56_p5, %p55_p3  ;;  %p115_p10 = scmp.eq.s32.totalorder %s640_s16, 1 }
  0x10   : > { %p971_p9 = por %p109_p6, %p49_p1  ;;  %p679_p13 = scmp.lt.s32.totalorder %s898_s14, 2 }
  0x11   : > { %s1296_s21 = scalar_select %p967_p8, 1, 0 }
  0x12   : > { %s1297_s22 = scalar_select %p971_p9, 1, 0 }
  0x13   : > { %s976_s23 = scalar_select %p40_p7, %s886_s11, %s42_s18  }
  0x14   : > { %p978_p11 = por %p115_p10, %p55_p3  ;;  %s985_s25 = sand.u32 1, %s886_s11  }
  0x15   : > { %s656_s26 = smul.u32 24, %s985_s25  ;;  %p991_p0 = pnand %p679_p13, %p961_p4 }
  0x16   : > { %s1298_s24 = scalar_select %p978_p11, 1, 0 }
  0x17   : > { %s657_s27 = smul.u32 384, %s894_s13  ;;  %s139_s4 = scalar_lea.vmem [#allocation2], %s656_s26 }
  0x18   : > { %s149_s5 = sshll.u32 %s139_s4, 4  ;;  %s136_s6 = scalar_lea.sflag [#allocation3], %s985_s25  ;;  %s1001_s5 = int_to_ptr.vmem [resolvable:$true] %s149_s5 }
  0x19   : > { %s999_s3 = scalar_lea.hbm %s1290_s0, %s657_s27  ;;  %p754_p3 = pneg %p991_p0 }
  0x1a   : > { %s752_s7 = scalar_lea.hbm %s999_s3, 384  ;;  %s757_s16 = scalar_lea.hbm %s1290_s0, 768 }
  0x1b   : > { %p753_p2 = scmp.ne.s32.totalorder %s999_s3, %s752_s7  ;;  %p758_p6 = scmp.lt.u32.totalorder %s999_s3, %s1290_s0 }
  0x1c   : > { %p759_p7 = scmp.lt.u32.totalorder %s757_s16, %s752_s7  ;;  %p761_p13 = scmp.lt.u32.totalorder %s752_s7, %s999_s3 }
  0x1d   : > { %p755_p4 = pnand %p754_p3, %p753_p2 }
  0x1e   : > { %p760_p10 = por %p759_p7, %p758_p6 }
  0x1f   : > { %p756_p5 = pneg %p755_p4 }
  0x20   : > { %p762_p12 = por %p761_p13, %p760_p10 }
  0x22   : > { %p763_p1 = pnand %p762_p12, %p756_p5 }
  0x24   : > { %766 = shalt.err (!%p763_p1)
}
  0x25   : > { %s767_s20 = scalar_lea.vmem %s1001_s5, 384  ;;  %s900_s26 = smov [#allocation2]  }
  0x26   : > { %p768_p2 = scmp.ne.s32.totalorder %s1001_s5, %s767_s20  ;;  %s772_s27 = sshll.u32 %s900_s26, 4  ;;  %s773_s27 = int_to_ptr.vmem [resolvable:$false] %s772_s27 }
  0x27   : > { %s774_s29 = scalar_lea.vmem %s773_s27, 768  ;;  %p775_p9 = scmp.lt.s32.totalorder %s1001_s5, %s773_s27 }
  0x28   : > { %p770_p4 = pnand %p768_p2, %p754_p3  ;;  %p776_p6 = scmp.lt.s32.totalorder %s774_s29, %s767_s20 }
  0x2a   : > { %p771_p11 = pneg %p770_p4  ;;  %p777_p7 = por %p776_p6, %p775_p9 }
  0x2c   : > { %p778_p10 = pnand %p777_p7, %p771_p11 }
  0x2e   : > { %781 = shalt.err (!%p778_p10)
}
  0x2f   : > { %671 = dma.hbm_to_vmem [thread:$0]  (!%p991_p0), %s999_s3, 384, %s1001_s5, %s136_s6  }
  0x30   : > { %p175_p12 = scmp.lt.s32.totalorder %s898_s14, 3  ;;  %s658_s30 = smul.u32 6, %s985_s25 }
  0x31   : > { %p1300_p1 = scmp.ge.s32.totalorder %s898_s14, 1  ;;  %s659_s7 = smul.u32 96, %s894_s13 }
  0x32   : > { %s160_s18 = scalar_lea.vmem [#allocation5], %s658_s30  ;;  %s157_s3 = scalar_lea.sflag [#allocation6], %s985_s25 }
  0x33   : > { %p1033_p5 = pnand %p1300_p1, %p175_p12  ;;  %s1041_s16 = scalar_lea.hbm %s1291_s1, %s659_s7 }
  0x34   : > { %s170_s19 = sshll.u32 %s160_s18, 4  ;;  %s782_s5 = scalar_lea.hbm %s1041_s16, 96  ;;  %s171_s19 = int_to_ptr.vmem [resolvable:$true] %s170_s19 }
  0x35   : > { %s1301_s4 = scalar_select %p1033_p5, 1, 0 }
  0x36   : > { %p783_p9 = scmp.ne.s32.totalorder %s1041_s16, %s782_s5  ;;  %s787_s26 = scalar_lea.hbm %s1291_s1, 192 }
  0x37   : > { %p788_p2 = scmp.lt.u32.totalorder %s1041_s16, %s1291_s1  ;;  %p789_p4 = scmp.lt.u32.totalorder %s787_s26, %s782_s5 }
  0x38   : > { %p785_p11 = pnand %p783_p9, %p754_p3  ;;  %p791_p7 = scmp.lt.u32.totalorder %s782_s5, %s1041_s16 }
  0x39   : > { %p790_p6 = por %p789_p4, %p788_p2 }
  0x3a   : > { %p786_p13 = pneg %p785_p11 }
  0x3b   : > { %p792_p10 = por %p791_p7, %p790_p6 }
  0x3d   : > { %p793_p12 = pnand %p792_p10, %p786_p13 }
  0x3f   : > { %796 = shalt.err (!%p793_p12)
}
  0x40   : > { %s797_s25 = scalar_lea.vmem %s171_s19, 96  ;;  %s901_s30 = smov [#allocation5]  }
  0x41   : > { %p798_p1 = scmp.ne.s32.totalorder %s171_s19, %s797_s25  ;;  %s802_s7 = sshll.u32 %s901_s30, 4  ;;  %s803_s7 = int_to_ptr.vmem [resolvable:$false] %s802_s7 }
  0x42   : > { %s804_s8 = scalar_lea.vmem %s803_s7, 192  ;;  %p805_p8 = scmp.lt.s32.totalorder %s171_s19, %s803_s7 }
  0x43   : > { %p800_p9 = pnand %p798_p1, %p754_p3  ;;  %p806_p5 = scmp.lt.s32.totalorder %s804_s8, %s797_s25 }
  0x45   : > { %p801_p11 = pneg %p800_p9  ;;  %p807_p2 = por %p806_p5, %p805_p8 }
  0x47   : > { %p808_p4 = pnand %p807_p2, %p801_p11 }
  0x49   : > { %811 = shalt.err (!%p808_p4)
}
  0x4a   : > { %674 = dma.hbm_to_vmem [thread:$0]  (!%p991_p0), %s1041_s16, 96, %s171_s19, %s157_s3  }
  0x4b   : > { %p1302_p13 = scmp.ne.s32.totalorder %s1301_s4, 0 }
  0x4c   : > { %s1066_s15 = sand.u32 (!%p1302_p13), 1, %s882_s10   ;;  %p1303_p8 = scmp.ne.s32.totalorder (!%p1302_p13), %s1296_s21, 0 }
  0x4d   : > { %179 = sbr.rel (%p1302_p13) target bundleno = 186 (0xba), region = 28  ;;  %s182_s5 = scalar_lea.sflag (!%p1302_p13), [#allocation3], %s1066_s15 }
  0x4e   : > { %s660_s18 = smul.u32 (!%p1302_p13), 24, %s1066_s15 }
  0x50   : > { %s185_s6 = scalar_lea.vmem (!%p1302_p13), [#allocation2], %s660_s18 }
  0x54   : > { %865 = dma.done.wait (%p1303_p8), %s182_s5, 384  }
  0x55   : > { %867 = vsyncadd (%p1303_p8), %s182_s5, 4294966912  ;;  %s661_s28 = smul.u32 6, %s1066_s15  ;;  %s191_s4 = scalar_lea.sflag [#allocation6], %s1066_s15 }
  0x57   : > { %s1078_s16 = scalar_lea.vmem [#allocation5], %s661_s28 }
  0x58   : > { %869 = dma.done.wait (%p1303_p8), %s191_s4, 96  }
  0x59   : > { %871 = vsyncadd (%p1303_p8), %s191_s4, 4294967200  ;;  %vm237_vm0 = vcmask 1043456   ;;  %v224_v0 = vld [vmem:[%s185_s6] sm:$0xff]  ;;  %v225_v1 = vld [vmem:[%s185_s6 + $0x8] sm:$0xff]  ;;  %v373_v63 = vlaneseq  ;;  %s219_s21 = scalar_lea.vmem [#allocation7], %s660_s18  ;;  %s655_s19 = smul.u32 384, %s890_s12 }
  0x5a   : > { %v231_v2 = vcombine.high %v224_v0, %v224_v0  ;;  %v238_v3 = vsel %vm237_vm0, %v224_v0, -inf  ;;  %v232_v5 = vcombine.high %v225_v1, %v225_v1  ;;  %v252_v9 = vsel %vm237_vm0, %v225_v1, -inf  ;;  %v226_v18 = vld [vmem:[%s185_s6 + $0x10] sm:$0xff]  ;;  %s531_s3 = sshll.u32 %s219_s21, 4  ;;  %s516_s29 = scalar_lea.sflag [#allocation4], %s1066_s15  ;;  %s1238_s3 = int_to_ptr.vmem [resolvable:$true] %s531_s3 }
  0x5b   : > { %v239_v4 = vrot.slane %v238_v3, 4  ;;  %v253_v10 = vrot.slane %v252_v9, 4  ;;  %v233_v25 = vcombine.high %v226_v18, %v226_v18  ;;  %v266_v26 = vsel %vm237_vm0, %v226_v18, -inf  ;;  %s1243_s27 = scalar_lea.hbm %s1292_s2, %s655_s19  ;;  %s812_s25 = scalar_lea.vmem %s1238_s3, 384 }
  0x5c   : > { %v245_v6 = vsel %vm237_vm0, %v231_v2, -inf  ;;  %v259_v11 = vsel %vm237_vm0, %v232_v5, -inf  ;;  %v267_v31 = vrot.slane %v266_v26, 4  ;;  %p813_p0 = scmp.ne.s32.totalorder %s1238_s3, %s812_s25  ;;  %p1316_p3 = scmp.ne.s32.totalorder %s1297_s22, 0 }
  0x5d   : > { %v240_v7 = vmax.f32 %v238_v3, %v239_v4  ;;  %v246_v8 = vrot.slane %v245_v6, 4  ;;  %v260_v14 = vrot.slane %v259_v11, 4  ;;  %v254_v15 = vmax.f32 %v252_v9, %v253_v10  ;;  %s904_s12 = smov [#allocation7]  }
  0x5e   : > { %v273_v32 = vsel %vm237_vm0, %v233_v25, -inf  ;;  %v268_v38 = vmax.f32 %v266_v26, %v267_v31  ;;  %p814_p5 = pnand %p813_p0, %p1316_p3  ;;  %s816_s30 = sshll.u32 %s904_s12, 4  ;;  %s817_s30 = int_to_ptr.vmem [resolvable:$false] %s816_s30 }
  0x5f   : > { %v241_v12 = vrot.slane %v240_v7, 2  ;;  %v247_v13 = vmax.f32 %v245_v6, %v246_v8  ;;  %v255_v19 = vrot.slane %v254_v15, 2  ;;  %v261_v20 = vmax.f32 %v259_v11, %v260_v14  ;;  %v1105_v8 = vld [vmem:[%s1078_s16] sm:$0x3f]  ;;  %s818_s7 = scalar_lea.vmem %s817_s30, 768  ;;  %p819_p7 = scmp.lt.s32.totalorder %s1238_s3, %s817_s30 }
  0x60   : > { %v274_v34 = vrot.slane %v273_v32, 4  ;;  %v269_v42 = vrot.slane %v268_v38, 2  ;;  %vm375_vm1 = vcmp.ne.s32.totalorder %v1105_v8, 4294967196  ;;  %p815_p6 = pneg %p814_p5  ;;  %p820_p10 = scmp.lt.s32.totalorder %s818_s7, %s812_s25 }
  0x61   : > { %v242_v16 = vmax.f32 %v240_v7, %v241_v12  ;;  %v248_v17 = vrot.slane %v247_v13, 2  ;;  %v256_v23 = vmax.f32 %v254_v15, %v255_v19  ;;  %v262_v24 = vrot.slane %v261_v20, 2 }
  0x62   : > { %v275_v39 = vmax.f32 %v273_v32, %v274_v34  ;;  %v270_v46 = vmax.f32 %v268_v38, %v269_v42  ;;  %p821_p12 = por %p820_p10, %p819_p7 }
  0x63   : > { %v243_v21 = vrot.slane %v242_v16, 1  ;;  %v249_v22 = vmax.f32 %v247_v13, %v248_v17  ;;  %v257_v29 = vrot.slane %v256_v23, 1  ;;  %v263_v30 = vmax.f32 %v261_v20, %v262_v24 }
  0x64   : > { %v276_v43 = vrot.slane %v275_v39, 2  ;;  %v271_v49 = vrot.slane %v270_v46, 1  ;;  %v1107_v13 = vshrl.u32 %v373_v63, 7  ;;  %p822_p1 = pnand %p821_p12, %p815_p6 }
  0x65   : > { %v244_v27 = vmax.f32 %v242_v16, %v243_v21  ;;  %v250_v28 = vrot.slane %v249_v22, 1  ;;  %v258_v35 = vmax.f32 %v256_v23, %v257_v29  ;;  %v264_v36 = vrot.slane %v263_v30, 1 }
  0x66   : > { %v277_v47 = vmax.f32 %v275_v39, %v276_v43  ;;  %v272_v52 = vmax.f32 %v270_v46, %v271_v49  ;;  %v378_v25 = vsub.s32 0, %v1107_v13  ;;  %v386_v38 = vsub.s32 2, %v1107_v13 }
  0x67   : > { %v251_v33 = vmax.f32 %v249_v22, %v250_v28  ;;  %v265_v40 = vmax.f32 %v263_v30, %v264_v36  ;;  %v398_v63 = vsub.s32 5, %v1107_v13 }
  0x68   : > { %v278_v50 = vrot.slane %v277_v47, 1 }
  0x69   : > { %v286_v37 = vcombine.low %v244_v27, %v251_v33  ;;  %v287_v44 = vcombine.low %v258_v35, %v265_v40  ;;  %v902_v27 = vmov 0   ;;  %v382_v35 = vsub.s32 1, %v1107_v13 }
  0x6a   : > { %v279_v53 = vmax.f32 %v277_v47, %v278_v50  ;;  %v406_v28 = vsel %vm375_vm1, 1, %v902_v27 }
  0x6b   : > { %v292_v41 = vsub.f32 %v224_v0, %v286_v37  ;;  %v293_v48 = vsub.f32 %v225_v1, %v287_v44  ;;  %v1122_v42 = vrot.slane %v406_v28, %v378_v25  ;;  %v390_v44 = vsub.s32 3, %v1107_v13 }
  0x6c   : > { %v288_v54 = vcombine.low %v272_v52, %v279_v53  ;;  %v383_v47 = vrot.slane %v1105_v8, %v382_v35  ;;  %v1131_v52 = vrot.slane %v406_v28, %v386_v38 }
  0x6d   : > { %v295_v45 = vmul.f32 1.442695, %v292_v41  ;;  %v297_v51 = vmul.f32 1.442695, %v293_v48  ;;  %v379_v41 = vrot.slane %v1105_v8, %v378_v25  ;;  %v1126_v48 = vrot.slane %v406_v28, %v382_v35 }
  0x6e   : > { %v294_v55 = vsub.f32 %v226_v18, %v288_v54  ;;  %vm431_vm3 = vcmp.eq.s32.totalorder %v1122_v42, 1  ;;  %v391_v53 = vrot.slane %v1105_v8, %v390_v44  ;;  %v1134_v54 = vrot.slane %v406_v28, %v390_v44 }
  0x6f   : > { %734 = vpow2.f32 %v295_v45  ;;  %vm400_vm2 = vcmp.eq.s32.totalorder %v1107_v13, %v379_v41  ;;  %vm401_vm4 = vcmp.eq.s32.totalorder %v1107_v13, %v383_v47  ;;  %vm432_vm5 = vcmp.eq.s32.totalorder %v1126_v48, 1 }
  0x70   : > { %736 = vpow2.f32 %v297_v51  ;;  %v299_v56 = vmul.f32 1.442695, %v294_v55  ;;  %v387_v51 = vrot.slane %v1105_v8, %v386_v38  ;;  %vm1141_vm6 = vmand %vm400_vm2, %vm431_vm3  ;;  %vm433_vm8 = vcmp.eq.s32.totalorder %v1131_v52, 1 }
  0x71   : > { %vm403_vm9 = vcmp.eq.s32.totalorder %v1107_v13, %v391_v53  ;;  %vm434_vm10 = vcmp.eq.s32.totalorder %v1134_v54, 1  ;;  %vm1152_vm11 = vmand %vm401_vm4, %vm432_vm5 }
  0x72   : > { %738 = vpow2.f32 %v299_v56  ;;  %vm402_vm7 = vcmp.eq.s32.totalorder %v1107_v13, %v387_v51  ;;  %vm1170_vm13 = vmand %vm403_vm9, %vm434_vm10 }
  0x73   : > { %vm1160_vm12 = vmand %vm402_vm7, %vm433_vm8 }
  0x74   : > { %v445_v44 = vsel %vm1160_vm12, 1, %v902_v27 }
  0x79   : > { %v1090_v57 = vpop.eup %734 }
  0x7a   : > { %v304_v58 = vcombine.high %v1090_v57, %v1090_v57  ;;  %v310_v59 = vsel %vm237_vm0, %v1090_v57, 0.0  ;;  %v1096_v61 = vpop.eup %736 }
  0x7b   : > { %v311_v60 = vrot.slane %v310_v59, 4  ;;  %v305_v2 = vcombine.high %v1096_v61, %v1096_v61  ;;  %v324_v3 = vsel %vm237_vm0, %v1096_v61, 0.0 }
  0x7c   : > { %v317_v62 = vsel %vm237_vm0, %v304_v58, 0.0  ;;  %v325_v4 = vrot.slane %v324_v3, 4  ;;  %v1109_v16 = vpop.eup %738  ;;  %v394_v58 = vsub.s32 4, %v1107_v13 }
  0x7d   : > { %v312_v0 = vadd.f32 %v311_v60, %v310_v59  ;;  %v318_v1 = vrot.slane %v317_v62, 4  ;;  %v331_v7 = vsel %vm237_vm0, %v305_v2, 0.0  ;;  %v306_v21 = vcombine.high %v1109_v16, %v1109_v16 }
  0x7e   : > { %v326_v9 = vadd.f32 %v325_v4, %v324_v3  ;;  %v332_v10 = vrot.slane %v331_v7, 4  ;;  %v338_v22 = vsel %vm237_vm0, %v1109_v16, 0.0  ;;  %v903_v4 = vmov 0.0  }
  0x7f   : > { %v313_v5 = vrot.slane %v312_v0, 2  ;;  %v319_v6 = vadd.f32 %v318_v1, %v317_v62  ;;  %v339_v26 = vrot.slane %v338_v22, 4  ;;  %v345_v31 = vsel %vm237_vm0, %v306_v21, 0.0 }
  0x80   : > { %v327_v14 = vrot.slane %v326_v9, 2  ;;  %v333_v15 = vadd.f32 %v332_v10, %v331_v7  ;;  %v346_v34 = vrot.slane %v345_v31, 4  ;;  %v395_v7 = vrot.slane %v1105_v8, %v394_v58 }
  0x81   : > { %v314_v11 = vadd.f32 %v313_v5, %v312_v0  ;;  %v320_v12 = vrot.slane %v319_v6, 2  ;;  %v340_v33 = vadd.f32 %v339_v26, %v338_v22  ;;  %v646_v5 = vsel %vm1141_vm6, 1.0, %v903_v4 }
  0x82   : > { %v328_v19 = vadd.f32 %v327_v14, %v326_v9  ;;  %v334_v20 = vrot.slane %v333_v15, 2  ;;  %v347_v40 = vadd.f32 %v346_v34, %v345_v31  ;;  %v1165_v9 = vrot.slane %v406_v28, %v394_v58 }
  0x83   : > { %v315_v17 = vrot.slane %v314_v11, 1  ;;  %v321_v18 = vadd.f32 %v320_v12, %v319_v6  ;;  %v341_v39 = vrot.slane %v340_v33, 2  ;;  %v399_v14 = vrot.slane %v1105_v8, %v398_v63 }
  0x84   : > { %v329_v29 = vrot.slane %v328_v19, 1  ;;  %v335_v30 = vadd.f32 %v334_v20, %v333_v15  ;;  %v348_v46 = vrot.slane %v347_v40, 2  ;;  %v1175_v15 = vrot.slane %v406_v28, %v398_v63 }
  0x85   : > { %v316_v23 = vadd.f32 %v315_v17, %v314_v11  ;;  %v322_v24 = vrot.slane %v321_v18, 1  ;;  %v342_v45 = vadd.f32 %v341_v39, %v340_v33  ;;  %v647_v17 = vsel %vm1152_vm11, 1.0, %v903_v4 }
  0x86   : > { %v330_v36 = vadd.f32 %v329_v29, %v328_v19  ;;  %v336_v37 = vrot.slane %v335_v30, 1  ;;  %v349_v50 = vadd.f32 %v348_v46, %v347_v40  ;;  %v648_v21 = vsel %vm1160_vm12, 1.0, %v903_v4 }
  0x87   : > { %v323_v32 = vadd.f32 %v322_v24, %v321_v18  ;;  %740 = vrcp.f32 %v316_v23  ;;  %v343_v49 = vrot.slane %v342_v45, 1  ;;  %v649_v22 = vsel %vm1170_vm13, 1.0, %v903_v4 }
  0x88   : > { %v337_v43 = vadd.f32 %v336_v37, %v335_v30  ;;  %v350_v56 = vrot.slane %v349_v50, 1  ;;  %vm404_vm14 = vcmp.eq.s32.totalorder %v1107_v13, %v395_v7  ;;  %vm435_vm15 = vcmp.eq.s32.totalorder %v1165_v9, 1 }
  0x89   : > { %742 = vrcp.f32 %v323_v32  ;;  %v344_v55 = vadd.f32 %v343_v49, %v342_v45  ;;  %vm405_vm0 = vcmp.eq.s32.totalorder %v1107_v13, %v399_v14  ;;  %vm436_vm1 = vcmp.eq.s32.totalorder %v1175_v15, 1  ;;  %vm1190_vm2 = vmand %vm404_vm14, %vm435_vm15 }
  0x8a   : > { %744 = vrcp.f32 %v330_v36  ;;  %v351_v60 = vadd.f32 %v350_v56, %v349_v50  ;;  %v443_v31 = vsel %vm1141_vm6, 1, %v902_v27  ;;  %vm1199_vm4 = vmand %vm405_vm0, %vm436_vm1  ;;  %v444_v34 = vsel %vm1152_vm11, 1, %v902_v27 }
  0x8b   : > { %746 = vrcp.f32 %v337_v43  ;;  %v650_v41 = vsel %vm1190_vm2, 1.0, %v903_v4  ;;  %v651_v42 = vsel %vm1199_vm4, 1.0, %v903_v4  ;;  %v446_v56 = vsel %vm1170_vm13, 1, %v902_v27 }
  0x8c   : > { %748 = vrcp.f32 %v344_v55  ;;  %v447_v3 = vsel %vm1190_vm2, 1, %v902_v27  ;;  %v448_v6 = vsel %vm1199_vm4, 1, %v902_v27 }
  0x8d   : > { %750 = vrcp.f32 %v351_v60 }
  0x91   : > { %v741_v59 = vpop.eup %740 }
  0x93   : > { %v743_v0 = vpop.eup %742 }
  0x94   : > { %v745_v1 = vpop.eup %744  ;;  %v364_v2 = vcombine.low %v741_v59, %v743_v0 }
  0x95   : > { %v747_v10 = vpop.eup %746 }
  0x96   : > { %v370_v11 = vmul.f32 %v1090_v57, %v364_v2  ;;  %v365_v18 = vcombine.low %v745_v1, %v747_v10  ;;  %v749_v24 = vpop.eup %748 }
  0x97   : > { %v751_v30 = vpop.eup %750 }
  0x98   : > { %v458_v19 = vcombine.high %v370_v11, %v370_v11  ;;  %v464_v20 = vsub.f32 %v646_v5, %v370_v11  ;;  %v371_v57 = vmul.f32 %v1096_v61, %v365_v18  ;;  %v366_v37 = vcombine.low %v749_v24, %v751_v30 }
  0x9a   : > { %v465_v8 = vsub.f32 %v647_v17, %v458_v19  ;;  %v470_v23 = vand.u32 2147483647, %v464_v20  ;;  %v459_v25 = vcombine.high %v371_v57, %v371_v57  ;;  %v466_v26 = vsub.f32 %v648_v21, %v371_v57 }
  0x9b   : > { %v372_v45 = vmul.f32 %v1109_v16, %v366_v37 }
  0x9c   : > { %v471_v28 = vand.u32 2147483647, %v465_v8  ;;  %v476_v29 = vsub.f32 0.0, %v470_v23  ;;  %v467_v32 = vsub.f32 %v649_v22, %v459_v25  ;;  %v472_v13 = vand.u32 2147483647, %v466_v26 }
  0x9d   : > { %v460_v53 = vcombine.high %v372_v45, %v372_v45  ;;  %v468_v48 = vsub.f32 %v650_v41, %v372_v45 }
  0x9e   : > { %v477_v35 = vsub.f32 0.0, %v471_v28  ;;  %v482_v36 = vsel %vm431_vm3, %v476_v29, 0.0  ;;  %v473_v39 = vand.u32 2147483647, %v467_v32  ;;  %v478_v40 = vsub.f32 0.0, %v472_v13 }
  0x9f   : > { %v494_v38 = vand.u32 4294967294, %v482_v36  ;;  %v469_v60 = vsub.f32 %v651_v42, %v460_v53  ;;  %v474_v62 = vand.u32 2147483647, %v468_v48 }
  0xa0   : > { %v483_v43 = vsel %vm432_vm5, %v477_v35, 0.0  ;;  %v479_v49 = vsub.f32 0.0, %v473_v39  ;;  %v484_v50 = vsel %vm433_vm8, %v478_v40, 0.0 }
  0xa1   : > { %v495_v46 = vand.u32 4294967294, %v483_v43  ;;  %v500_v47 = vor.u32 %v494_v38, %v443_v31  ;;  %v496_v51 = vand.u32 4294967294, %v484_v50  ;;  %v475_v0 = vand.u32 2147483647, %v469_v60 }
  0xa2   : > { %v485_v16 = vsel %vm434_vm10, %v479_v49, 0.0  ;;  %v480_v1 = vsub.f32 0.0, %v474_v62 }
  0xa3   : > { %v501_v55 = vor.u32 %v495_v46, %v444_v34  ;;  %v497_v58 = vand.u32 4294967294, %v485_v16  ;;  %v502_v59 = vor.u32 %v496_v51, %v445_v44  ;;  %v481_v54 = vsub.f32 0.0, %v475_v0 }
  0xa4   : > { %v486_v4 = vsel %vm435_vm15, %v480_v1, 0.0 }
  0xa5   : > { %v506_v63 = vcombine.low %v500_v47, %v501_v55  ;;  %v503_v52 = vor.u32 %v497_v58, %v446_v56  ;;  %v498_v5 = vand.u32 4294967294, %v486_v4  ;;  %v487_v7 = vsel %vm436_vm1, %v481_v54, 0.0 }
  0xa6   : > { %v499_v10 = vand.u32 4294967294, %v487_v7 }
  0xa7   : > { %512 = vst [vmem:[%s219_s21] sm:$0xff] %v506_v63  ;;  %v507_v2 = vcombine.low %v502_v59, %v503_v52  ;;  %v504_v11 = vor.u32 %v498_v5, %v447_v3 }
  0xa8   : > { %v505_v12 = vor.u32 %v499_v10, %v448_v6 }
  0xa9   : > { %513 = vst [vmem:[%s219_s21 + $0x8] sm:$0xff] %v507_v2 }
  0xaa   : > { %v508_v9 = vcombine.low %v504_v11, %v505_v12 }
  0xac   : > { %514 = vst [vmem:[%s219_s21 + $0x10] sm:$0xff] %v508_v9 }
  0xad   : > { %825 = shalt.err (!%p822_p1)
}
  0xae   : > { %s826_s8 = scalar_lea.hbm %s1243_s27, 384  ;;  %s830_s5 = scalar_lea.hbm %s1292_s2, 768 }
  0xaf   : > { %p827_p9 = scmp.ne.s32.totalorder %s1243_s27, %s826_s8  ;;  %p831_p4 = scmp.lt.u32.totalorder %s1243_s27, %s1292_s2 }
  0xb0   : > { %p832_p13 = scmp.lt.u32.totalorder %s830_s5, %s826_s8  ;;  %p834_p0 = scmp.lt.u32.totalorder %s826_s8, %s1243_s27 }
  0xb1   : > { %p828_p11 = pnand %p827_p9, %p1316_p3 }
  0xb2   : > { %p833_p8 = por %p832_p13, %p831_p4 }
  0xb3   : > { %p829_p2 = pneg %p828_p11 }
  0xb4   : > { %p835_p5 = por %p834_p0, %p833_p8 }
  0xb6   : > { %p836_p6 = pnand %p835_p5, %p829_p2 }
  0xb8   : > { %839 = shalt.err (!%p836_p6)
}
  0xb9   : > { %666 = dma.vmem_to_hbm [thread:$0]  (%p1316_p3), %s1238_s3, 384, %s1243_s27, %s516_s29  }
  0xba PF: > { %s543_s4 = sand.u32 1, %s878_s9   ;;  %p1317_p7 = scmp.ne.s32.totalorder %s1298_s24, 0 }
  0xbb   : > { %p1318_p10 = scmp.ge.s32.totalorder %s898_s14, 2  ;;  %s544_s16 = scalar_lea.sflag [#allocation4], %s543_s4 }
  0xbd   : > { %p676_p12 = pnand %p1318_p10, %p1317_p7 }
  0xbf   : > { %873 = dma.done.wait (!%p676_p12), %s544_s16, 384  }
  0xc0   : > { %875 = vsyncadd (!%p676_p12), %s544_s16, 4294966912  ;;  %s21_s14 = sadd.s32 1, %s898_s14   ;;  %s1319_s9 = smov %s882_s10 }
  0xc1   : > { %p18_p1 = scmp.ge.s32.totalorder %s21_s14, 4   ;;  %s1320_s10 = smov %s886_s11 }
  0xc2   : > { %s1321_s11 = smov %s976_s23  ;;  %s1322_s12 = smov %s894_s13 }
  0xc3   : > { %s1323_s13 = smov %s1325_s17  ;;  %20 = sbr.rel (!%p18_p1) target bundleno = 8 (0x8), region = 86 }
  0xca   :  { %549 = vsyncpa [#allocation3], 1 }
  0xcb   :  { %551 = vsyncpa [#allocation3 + $0x1], 1 }
  0xcc   :  { %552 = vsyncpa [#allocation6], 1 }
  0xcd   :  { %554 = vsyncpa [#allocation6 + $0x1], 1 }
  0xce   :  { %555 = vsyncpa [#allocation4], 1 }
  0xcf   :  { %557 = vsyncpa [#allocation4 + $0x1], 1 }

</bundles_post_ra>
